<compile_context>
chip_gen: v6e
topology: v6e:2x2x1
jax: 0.10.0
libtpu: 0.0.40
codegen_flags: <defaults>
</compile_context>

<pallas_src>
import functools

import jax
import jax.numpy as jnp
from jax.experimental import pallas as pl
from jax.experimental.pallas import tpu as pltpu


def _round_up(x, m):
    return (x + m - 1) // m * m


def _prenet_kernel(x_ref, bits_ref, w1_ref, b1_ref, w2_ref, b2_ref, o_ref,
                   *, keep_thr, out_scale):
    # uint32 random word per output element; two disjoint 16-bit fields give
    # the two layers' dropout masks via an integer threshold compare.
    bits = bits_ref[...]
    keep1 = (bits & jnp.uint32(0xFFFF)) < jnp.uint32(keep_thr)
    keep2 = (bits >> jnp.uint32(16)) < jnp.uint32(keep_thr)

    # Layer 1: Linear (bf16 MXU, f32 accumulate) -> bias -> ReLU -> mask.
    # (The 1/(1-p) scale for this layer is pre-folded into w2 on the host.)
    h = jnp.dot(x_ref[...], w1_ref[...], preferred_element_type=jnp.float32)
    h = jnp.maximum(h + b1_ref[...], 0.0)
    h = jnp.where(keep1, h, 0.0)

    # Layer 2: Linear (bf16 MXU, f32 accumulate) -> bias -> ReLU -> dropout.
    y = jnp.dot(h.astype(w2_ref.dtype), w2_ref[...],
                preferred_element_type=jnp.float32)
    y = jnp.maximum(y + b2_ref[...], 0.0)
    # Layer-2 dropout: mask, apply 1/(1-p) once as part of the store expression.
    o_ref[...] = (jnp.where(keep2, y, 0.0) * out_scale).astype(o_ref.dtype)


def decoder_prenet(x, params, key, *, dropout_rate=0.5, tm_max=256):
    """x: (B, ..., idim) float32. Returns (B, ..., n_units) float32."""
    w1, b1, w2, b2 = params
    idim, n_units = w1.shape
    assert x.shape[-1] == idim

    lead_shape = x.shape[:-1]
    x2d = x.reshape(-1, idim)
    M = x2d.shape[0]

    scale = 1.0 / (1.0 - dropout_rate)

    # Fold the layer-1 dropout scale into w2 (one-time host-side op), then cast
    # matmul operands to bf16 for the MXU (f32 accumulation inside the kernel).
    x_bf = x2d.astype(jnp.bfloat16)
    w1_bf = w1.astype(jnp.bfloat16)
    w2_bf = (w2 * scale).astype(jnp.bfloat16)
    b1_f32 = b1.astype(jnp.float32)
    b2_f32 = b2.astype(jnp.float32)

    # Row tiling: tm multiple of 8, capped at tm_max; pad M so the grid divides
    # evenly (padded rows are computed and sliced off afterwards).
    tm = min(tm_max, _round_up(M, 8))
    M_pad = _round_up(M, tm)
    if M_pad != M:
        x_bf = jnp.pad(x_bf, ((0, M_pad - M), (0, 0)))

    # One uint32 per output element: both layers' dropout masks in one draw.
    bits = jax.random.bits(key, (M_pad, n_units), dtype=jnp.uint32)
    keep_thr = min(int(round((1.0 - dropout_rate) * 65536.0)), 0xFFFFFFFF)

    grid = (M_pad // tm,)
    kernel = functools.partial(_prenet_kernel,
                               keep_thr=keep_thr, out_scale=scale)

    # TODO(synk): if n_units < 128, pad the feature axis to 128 in this wrapper
    # to keep output stores lane-dense (standard prenet uses n_units=256).
    out2d = pl.pallas_call(
        kernel,
        out_shape=jax.ShapeDtypeStruct((M_pad, n_units), jnp.float32),
        grid_spec=pltpu.PrefetchScalarGridSpec(
            num_scalar_prefetch=0,
            grid=grid,
            in_specs=[
                pl.BlockSpec((tm, idim),         lambda i: (i, 0)),  # x tile
                pl.BlockSpec((tm, n_units),      lambda i: (i, 0)),  # rng bits
                pl.BlockSpec((idim, n_units),    lambda i: (0, 0)),  # w1
                pl.BlockSpec((1, n_units),       lambda i: (0, 0)),  # b1
                pl.BlockSpec((n_units, n_units), lambda i: (0, 0)),  # w2
                pl.BlockSpec((1, n_units),       lambda i: (0, 0)),  # b2
            ],
            out_specs=pl.BlockSpec((tm, n_units), lambda i: (i, 0)),
        ),
        compiler_params=pltpu.CompilerParams(
            dimension_semantics=("parallel",),     # shard row tiles on v7x
            vmem_limit_bytes=32 * 1024 * 1024,     # explicit VMEM budget
        ),
    )(x_bf, bits, w1_bf, b1_f32, w2_bf, b2_f32)

    return out2d[:M].reshape(*lead_shape, n_units)


def init_params(key, idim, n_units):
    """Deterministic init mimicking torch.nn.Linear (U[-1/sqrt(fan_in), ...])."""
    k1, k2, k3, k4 = jax.random.split(key, 4)
    lim1 = 1.0 / jnp.sqrt(idim)
    lim2 = 1.0 / jnp.sqrt(n_units)
    w1 = jax.random.uniform(k1, (idim, n_units), jnp.float32, -lim1, lim1)
    b1 = jax.random.uniform(k2, (1, n_units), jnp.float32, -lim1, lim1)
    w2 = jax.random.uniform(k3, (n_units, n_units), jnp.float32, -lim2, lim2)
    b2 = jax.random.uniform(k4, (1, n_units), jnp.float32, -lim2, lim2)
    return w1, b1, w2, b2


if __name__ == "__main__":
    key = jax.random.PRNGKey(0)
    k_x, k_p, k_d = jax.random.split(key, 3)

    # Small shapes consistent with the module: (B, T, idim) -> (B, T, n_units)
    B, T, idim, n_units = 2, 8, 80, 256
    x = jax.random.normal(k_x, (B, T, idim), dtype=jnp.float32)
    params = init_params(k_p, idim, n_units)

    out = decoder_prenet(x, params, k_d, dropout_rate=0.5)
    out = jax.block_until_ready(out)

    assert out.shape == (B, T, n_units)
    assert out.dtype == jnp.float32
    # ReLU + dropout => all outputs non-negative, and dropout should zero some.
    assert bool(jnp.all(out >= 0.0))
    assert bool(jnp.any(out == 0.0))

    print("KERNEL_OK")
</pallas_src>

<mosaic_0001>
module attributes {stable_mosaic.version = 11 : i64} {
  func.func @_prenet_kernel(%arg0: i32, %arg1: memref<16x80xbf16, #tpu.memory_space<vmem>>, %arg2: memref<16x256xi32, #tpu.memory_space<vmem>>, %arg3: memref<80x256xbf16, #tpu.memory_space<vmem>>, %arg4: memref<1x256xf32, #tpu.memory_space<vmem>>, %arg5: memref<256x256xbf16, #tpu.memory_space<vmem>>, %arg6: memref<1x256xf32, #tpu.memory_space<vmem>>, %arg7: memref<16x256xf32, #tpu.memory_space<vmem>>) attributes {dimension_semantics = [#tpu.dimension_semantics<parallel>], iteration_bounds = array<i64: 1>, scalar_prefetch = 0 : i64, scratch_operands = 0 : i64, tpu.core_type = #tpu.core_type<tc>, window_params = [{transform_indices = @transform_0, window_bounds = array<i64: 16, 80>}, {transform_indices = @transform_1, window_bounds = array<i64: 16, 256>}, {pipeline_mode = #tpu.pipeline_mode<synchronous>, transform_indices = @transform_2, window_bounds = array<i64: 80, 256>}, {pipeline_mode = #tpu.pipeline_mode<synchronous>, transform_indices = @transform_3, window_bounds = array<i64: 1, 256>}, {pipeline_mode = #tpu.pipeline_mode<synchronous>, transform_indices = @transform_4, window_bounds = array<i64: 256, 256>}, {pipeline_mode = #tpu.pipeline_mode<synchronous>, transform_indices = @transform_5, window_bounds = array<i64: 1, 256>}, {transform_indices = @transform_6, window_bounds = array<i64: 16, 256>}]} {
    %c0 = arith.constant 0 : index
    %c0_0 = arith.constant 0 : index
    %0 = vector.load %arg2[%c0, %c0_0] : memref<16x256xi32, #tpu.memory_space<vmem>>, vector<16x256xi32>
    %c65535_i32 = arith.constant 65535 : i32
    %1 = vector.broadcast %c65535_i32 : i32 to vector<16x256xi32>
    %2 = arith.andi %0, %1 : vector<16x256xi32>
    %c32768_i32 = arith.constant 32768 : i32
    %3 = vector.broadcast %c32768_i32 : i32 to vector<16x256xi32>
    %4 = arith.cmpi ult, %2, %3 : vector<16x256xi32>
    %c16_i32 = arith.constant 16 : i32
    %5 = vector.broadcast %c16_i32 : i32 to vector<16x256xi32>
    %6 = arith.shrui %0, %5 : vector<16x256xi32>
    %c32768_i32_1 = arith.constant 32768 : i32
    %7 = vector.broadcast %c32768_i32_1 : i32 to vector<16x256xi32>
    %8 = arith.cmpi ult, %6, %7 : vector<16x256xi32>
    %c0_2 = arith.constant 0 : index
    %c0_3 = arith.constant 0 : index
    %9 = vector.load %arg1[%c0_2, %c0_3] : memref<16x80xbf16, #tpu.memory_space<vmem>>, vector<16x80xbf16>
    %c0_4 = arith.constant 0 : index
    %c0_5 = arith.constant 0 : index
    %10 = vector.load %arg3[%c0_4, %c0_5] : memref<80x256xbf16, #tpu.memory_space<vmem>>, vector<80x256xbf16>
    %cst = arith.constant dense<0.000000e+00> : vector<16x256xf32>
    %11 = tpu.matmul %9, %10, %cst {dimension_numbers = #tpu.dot_dimension_numbers<[1], [0], [0], [1], [0, 0, 1, 1], [], []>} : vector<16x80xbf16>, vector<80x256xbf16>, vector<16x256xf32> -> vector<16x256xf32>
    %c0_6 = arith.constant 0 : index
    %c0_7 = arith.constant 0 : index
    %12 = vector.load %arg4[%c0_6, %c0_7] : memref<1x256xf32, #tpu.memory_space<vmem>>, vector<1x256xf32>
    %13 = vector.broadcast %12 : vector<1x256xf32> to vector<16x256xf32>
    %14 = arith.addf %11, %13 : vector<16x256xf32>
    %cst_8 = arith.constant 0.000000e+00 : f32
    %15 = vector.broadcast %cst_8 : f32 to vector<16x256xf32>
    %16 = arith.maximumf %14, %15 : vector<16x256xf32>
    %cst_9 = arith.constant 0.000000e+00 : f32
    %17 = vector.broadcast %cst_9 : f32 to vector<16x256xf32>
    %18 = arith.select %4, %16, %17 : vector<16x256xi1>, vector<16x256xf32>
    %19 = arith.truncf %18 : vector<16x256xf32> to vector<16x256xbf16>
    %c0_10 = arith.constant 0 : index
    %c0_11 = arith.constant 0 : index
    %20 = vector.load %arg5[%c0_10, %c0_11] : memref<256x256xbf16, #tpu.memory_space<vmem>>, vector<256x256xbf16>
    %cst_12 = arith.constant dense<0.000000e+00> : vector<16x256xf32>
    %21 = tpu.matmul %19, %20, %cst_12 {dimension_numbers = #tpu.dot_dimension_numbers<[1], [0], [0], [1], [0, 0, 1, 1], [], []>} : vector<16x256xbf16>, vector<256x256xbf16>, vector<16x256xf32> -> vector<16x256xf32>
    %c0_13 = arith.constant 0 : index
    %c0_14 = arith.constant 0 : index
    %22 = vector.load %arg6[%c0_13, %c0_14] : memref<1x256xf32, #tpu.memory_space<vmem>>, vector<1x256xf32>
    %23 = vector.broadcast %22 : vector<1x256xf32> to vector<16x256xf32>
    %24 = arith.addf %21, %23 : vector<16x256xf32>
    %cst_15 = arith.constant 0.000000e+00 : f32
    %25 = vector.broadcast %cst_15 : f32 to vector<16x256xf32>
    %26 = arith.maximumf %24, %25 : vector<16x256xf32>
    %cst_16 = arith.constant 0.000000e+00 : f32
    %27 = vector.broadcast %cst_16 : f32 to vector<16x256xf32>
    %28 = arith.select %8, %26, %27 : vector<16x256xi1>, vector<16x256xf32>
    %cst_17 = arith.constant 2.000000e+00 : f32
    %29 = vector.broadcast %cst_17 : f32 to vector<16x256xf32>
    %30 = arith.mulf %28, %29 : vector<16x256xf32>
    %c0_18 = arith.constant 0 : index
    %c0_19 = arith.constant 0 : index
    %31 = vector.load %arg7[%c0_18, %c0_19] : memref<16x256xf32, #tpu.memory_space<vmem>>, vector<16x256xf32>
    tpu.vector_store %arg7[%c0_18, %c0_19], %30 {strides = array<i32>} : memref<16x256xf32, #tpu.memory_space<vmem>>, vector<16x256xf32>,
    return
  }
  func.func @transform_0(%arg0: i32) -> (i32, i32) {
    %c0_i32 = arith.constant 0 : i32
    %c0_i32_0 = arith.constant 0 : i32
    return %arg0, %c0_i32 : i32, i32
  }
  func.func @transform_1(%arg0: i32) -> (i32, i32) {
    %c0_i32 = arith.constant 0 : i32
    %c0_i32_0 = arith.constant 0 : i32
    return %arg0, %c0_i32 : i32, i32
  }
  func.func @transform_2(%arg0: i32) -> (i32, i32) {
    %c0_i32 = arith.constant 0 : i32
    %c0_i32_0 = arith.constant 0 : i32
    %c0_i32_1 = arith.constant 0 : i32
    return %c0_i32, %c0_i32_0 : i32, i32
  }
  func.func @transform_3(%arg0: i32) -> (i32, i32) {
    %c0_i32 = arith.constant 0 : i32
    %c0_i32_0 = arith.constant 0 : i32
    %c0_i32_1 = arith.constant 0 : i32
    return %c0_i32, %c0_i32_0 : i32, i32
  }
  func.func @transform_4(%arg0: i32) -> (i32, i32) {
    %c0_i32 = arith.constant 0 : i32
    %c0_i32_0 = arith.constant 0 : i32
    %c0_i32_1 = arith.constant 0 : i32
    return %c0_i32, %c0_i32_0 : i32, i32
  }
  func.func @transform_5(%arg0: i32) -> (i32, i32) {
    %c0_i32 = arith.constant 0 : i32
    %c0_i32_0 = arith.constant 0 : i32
    %c0_i32_1 = arith.constant 0 : i32
    return %c0_i32, %c0_i32_0 : i32, i32
  }
  func.func @transform_6(%arg0: i32) -> (i32, i32) {
    %c0_i32 = arith.constant 0 : i32
    %c0_i32_0 = arith.constant 0 : i32
    return %arg0, %c0_i32 : i32, i32
  }
}

</mosaic_0001>

<bundles_post_ra>
// kernel: tpu_custom_call.1
= control target key start
LH: loop header
LB: loop body
LE: loop exit
PB: predicated region body
PF: predicated region fallthrough
CT: control target
= control target key end

     0   :  { %11 = vsyncpa [#allocation3], 0  ;;  %s826_s0 = inlined_call_operand.hbm [shape: bf16[16,80], index: 0, kind: input, shape index: {}]   ;;  %s827_s1 = inlined_call_operand.hbm [shape: u32[16,256], index: 1, kind: input, shape index: {}]   ;;  %s828_s2 = inlined_call_operand.hbm [shape: bf16[80,256], index: 2, kind: input, shape index: {}]   ;;  %s829_s3 = inlined_call_operand.vmem [shape: f32[1,256], index: 3, kind: input, shape index: {}]   ;;  %s830_s4 = inlined_call_operand.hbm [shape: bf16[256,256], index: 4, kind: input, shape index: {}]   ;;  %s831_s5 = inlined_call_operand.vmem [shape: f32[1,256], index: 5, kind: input, shape index: {}]   ;;  %s832_s6 = inlined_call_operand.hbm [shape: f32[16,256], index: 6, kind: output, shape index: {}]  }
   0x1   :  { %12 = vsyncpa [#allocation6], 0 }
   0x2   :  { %13 = vsyncpa [#allocation9], 0 }
   0x3   :  { %14 = vsyncpa [#allocation4], 0  ;;  %s752_s21 = smov [#allocation5]  }
   0x4   :  { %s32_s22 = sshll.u32 %s752_s21, 4  ;;  %s33_s22 = int_to_ptr.vmem [resolvable:$true] %s32_s22 }
   0x5   :  { %s652_s23 = scalar_lea.vmem %s33_s22, 512  ;;  %p657_p1 = scmp.lt.s32.totalorder %s33_s22, %s33_s22 }
   0x6   :  { %p653_p0 = scmp.ne.s32.totalorder %s33_s22, %s652_s23  ;;  %p658_p2 = scmp.lt.s32.totalorder %s652_s23, %s652_s23 }
   0x8   :  { %p659_p3 = por %p658_p2, %p657_p1 }
   0xa   :  { %p660_p4 = pnand %p659_p3, %p653_p0 }
   0xc   :  { %663 = shalt.err (!%p660_p4)
}
   0xd   :  { %s753_s24 = smov 256   ;;  %s754_s25 = smov 16  }
   0xe   :  { %38 = dma.hbm_to_vmem [thread:$0]  %s827_s1, 512, %s33_s22, [#allocation6], %s753_s24, %s753_s24, %s754_s25  }
   0xf   :  { %s755_s28 = smov [#allocation2]  }
  0x10   :  { %s20_s29 = sshll.u32 %s755_s28, 4  ;;  %s21_s29 = int_to_ptr.vmem [resolvable:$true] %s20_s29 }
  0x11   :  { %s672_s30 = scalar_lea.vmem %s21_s29, 128  ;;  %p677_p6 = scmp.lt.s32.totalorder %s21_s29, %s21_s29 }
  0x12   :  { %p673_p5 = scmp.ne.s32.totalorder %s21_s29, %s672_s30  ;;  %p678_p7 = scmp.lt.s32.totalorder %s672_s30, %s672_s30 }
  0x14   :  { %p679_p8 = por %p678_p7, %p677_p6 }
  0x16   :  { %p680_p9 = pnand %p679_p8, %p673_p5 }
  0x18   :  { %683 = shalt.err (!%p680_p9)
}
  0x19   :  { %s756_s7 = smov 64   ;;  %s757_s8 = smov 4  }
  0x1a   :  { %26 = dma.hbm_to_vmem [thread:$0]  %s826_s0, 128, %s21_s29, [#allocation3], %s756_s7, %s756_s7, %s757_s8  }
  0x1b   :  { %s758_s11 = smov [#allocation7]  }
  0x1c   :  { %s44_s12 = sshll.u32 %s758_s11, 4  ;;  %s45_s12 = int_to_ptr.vmem [resolvable:$true] %s44_s12 }
  0x1d   :  { %s692_s1 = scalar_lea.vmem %s45_s12, 1280  ;;  %p697_p11 = scmp.lt.s32.totalorder %s45_s12, %s45_s12 }
  0x1e   :  { %p693_p10 = scmp.ne.s32.totalorder %s45_s12, %s692_s1  ;;  %p698_p12 = scmp.lt.s32.totalorder %s692_s1, %s692_s1 }
  0x20   :  { %p699_p13 = por %p698_p12, %p697_p11 }
  0x22   :  { %p700_p0 = pnand %p699_p13, %p693_p10 }
  0x24   :  { %703 = shalt.err (!%p700_p0)
}
  0x25   :  { %s759_s13 = smov 128   ;;  %s760_s14 = smov 8  }
  0x26   :  { %50 = dma.hbm_to_vmem [thread:$0]  %s828_s2, 1280, %s45_s12, [#allocation6], %s759_s13, %s759_s13, %s760_s14  }
  0x27   :  { %s761_s17 = smov [#allocation8]  }
  0x28   :  { %s58_s18 = sshll.u32 %s761_s17, 4  ;;  %s59_s18 = int_to_ptr.vmem [resolvable:$true] %s58_s18 }
  0x29   :  { %s712_s0 = scalar_lea.vmem %s59_s18, 4096  ;;  %p717_p2 = scmp.lt.s32.totalorder %s59_s18, %s59_s18 }
  0x2a   :  { %p713_p1 = scmp.ne.s32.totalorder %s59_s18, %s712_s0  ;;  %p718_p3 = scmp.lt.s32.totalorder %s712_s0, %s712_s0 }
  0x2c   :  { %p719_p4 = por %p718_p3, %p717_p2 }
  0x2e   :  { %p720_p5 = pnand %p719_p4, %p713_p1 }
  0x30   :  { %723 = shalt.err (!%p720_p5)
}
  0x31   :  { %64 = dma.hbm_to_vmem [thread:$0]  %s830_s4, 4096, %s59_s18, [#allocation9], %s759_s13, %s759_s13, %s760_s14  }
  0x32   :  { %744 = dma.done.wait [#allocation3], 128  }
  0x33   :  { %745 = vsyncadd [#allocation3], 4294967168 }
  0x34   :  { %746 = dma.done.wait [#allocation6], 1792  }
  0x35   :  { %747 = vsyncadd [#allocation6], 4294965504 }
  0x36   :  { %748 = dma.done.wait [#allocation9], 4096  }
  0x37   :  { %749 = vsyncadd [#allocation9], 4294963200  ;;  %v762_v0 = vmov 0   ;;  %v580_v1 = vld [vmem:[#allocation7 + $0x44] ss:$8 sps:$4 sm:$0xff]   ;;  %v595_v18 = vld [vmem:[#allocation2] sm:$0xff]   ;;  %v114_v44 = vlaneseq }
  0x38   :  { %215 = vmatprep.mubr.bf16.mxu0 %v762_v0  ;;  %v582_v2 = vld [vmem:[#allocation7 + $0x40] ss:$8 sps:$4 sm:$0xff]   ;;  %189 = vmatprep.subr.bf16.mxu0 %v580_v1  ;;  %v583_v3 = vld [vmem:[#allocation7 + $0x34] ss:$8 sps:$4 sm:$0xff]   ;;  %v585_v4 = vld [vmem:[#allocation7 + $0x30] ss:$8 sps:$4 sm:$0xff]  }
  0x39   :  { %190 = vmatpush1.bf16.msra.mxu0 %v582_v2  ;;  %v586_v5 = vld [vmem:[#allocation7 + $0x24] ss:$8 sps:$4 sm:$0xff]   ;;  %v588_v6 = vld [vmem:[#allocation7 + $0x20] ss:$8 sps:$4 sm:$0xff]   ;;  %v589_v7 = vld [vmem:[#allocation7 + $0x14] ss:$8 sps:$4 sm:$0xff]  }
  0x3a   :  { %191 = vmatprep.subr.bf16.mxu0 %v583_v3  ;;  %v596_v8 = vld [vmem:[#allocation8 + $0x74] ss:$8 sps:$4 sm:$0xff]   ;;  %v598_v9 = vld [vmem:[#allocation8 + $0x70] ss:$8 sps:$4 sm:$0xff]   ;;  %v599_v10 = vld [vmem:[#allocation8 + $0x64] ss:$8 sps:$4 sm:$0xff]  }
  0x3b   :  { %440 = vmatprep.subr.bf16.mxu1 %v596_v8  ;;  %v591_v11 = vld [vmem:[#allocation7 + $0x10] ss:$8 sps:$4 sm:$0xff]   ;;  %v592_v13 = vld [vmem:[#allocation7 + $0x4] ss:$8 sps:$4 sm:$0xff]   ;;  %v594_v15 = vld [vmem:[#allocation7] ss:$8 sps:$4 sm:$0xff]  }
  0x3c   :  { %441 = vmatpush1.bf16.msra.mxu1 %v598_v9  ;;  %v601_v12 = vld [vmem:[#allocation8 + $0x60] ss:$8 sps:$4 sm:$0xff]   ;;  %v602_v14 = vld [vmem:[#allocation8 + $0x54] ss:$8 sps:$4 sm:$0xff]   ;;  %v604_v16 = vld [vmem:[#allocation8 + $0x50] ss:$8 sps:$4 sm:$0xff]  }
  0x3d   :  { %192 = vmatpush1.bf16.msra.mxu0 %v585_v4  ;;  %442 = vmatprep.subr.bf16.mxu1 %v599_v10  ;;  %v605_v17 = vld [vmem:[#allocation8 + $0x44] ss:$8 sps:$4 sm:$0xff]   ;;  %vm179_vm0 = vcmask 654336   ;;  %v607_v19 = vld [vmem:[#allocation8 + $0x40] ss:$8 sps:$4 sm:$0xff]   ;;  %v115_v45 = vshrl.u32 %v114_v44, 7 }
  0x3e   :  { %193 = vmatprep.subr.bf16.mxu0 %v586_v5  ;;  %v608_v20 = vld [vmem:[#allocation8 + $0x34] ss:$8 sps:$4 sm:$0xff]   ;;  %v610_v21 = vld [vmem:[#allocation8 + $0x30] ss:$8 sps:$4 sm:$0xff]   ;;  %v611_v22 = vld [vmem:[#allocation8 + $0x24] ss:$8 sps:$4 sm:$0xff]  }
  0x3f   :  { %v613_v23 = vld [vmem:[#allocation8 + $0x20] ss:$8 sps:$4 sm:$0xff]   ;;  %v614_v24 = vld [vmem:[#allocation8 + $0x14] ss:$8 sps:$4 sm:$0xff]   ;;  %v616_v25 = vld [vmem:[#allocation8 + $0x10] ss:$8 sps:$4 sm:$0xff]  }
  0x40   :  { %443 = vmatpush1.bf16.msra.mxu1 %v601_v12  ;;  %v617_v26 = vld [vmem:[#allocation8 + $0x4] ss:$8 sps:$4 sm:$0xff]   ;;  %v619_v27 = vld [vmem:[#allocation8] ss:$8 sps:$4 sm:$0xff]   ;;  %v620_v28 = vld [vmem:[#allocation8 + $0xf4] ss:$8 sps:$4 sm:$0xff]  }
  0x41   :  { %194 = vmatpush1.bf16.msra.mxu0 %v588_v6  ;;  %444 = vmatprep.subr.bf16.mxu1 %v602_v14  ;;  %v622_v29 = vld [vmem:[#allocation8 + $0xf0] ss:$8 sps:$4 sm:$0xff]   ;;  %v623_v30 = vld [vmem:[#allocation8 + $0xe4] ss:$8 sps:$4 sm:$0xff]   ;;  %v625_v31 = vld [vmem:[#allocation8 + $0xe0] ss:$8 sps:$4 sm:$0xff]  }
  0x42   :  { %195 = vmatprep.subr.bf16.mxu0 %v589_v7  ;;  %v626_v32 = vld [vmem:[#allocation8 + $0xd4] ss:$8 sps:$4 sm:$0xff]   ;;  %v628_v33 = vld [vmem:[#allocation8 + $0xd0] ss:$8 sps:$4 sm:$0xff]   ;;  %v629_v34 = vld [vmem:[#allocation8 + $0xc4] ss:$8 sps:$4 sm:$0xff]  }
  0x43   :  { %v631_v35 = vld [vmem:[#allocation8 + $0xc0] ss:$8 sps:$4 sm:$0xff]   ;;  %v632_v36 = vld [vmem:[#allocation8 + $0xb4] ss:$8 sps:$4 sm:$0xff]   ;;  %v634_v37 = vld [vmem:[#allocation8 + $0xb0] ss:$8 sps:$4 sm:$0xff]  }
  0x44   :  { %445 = vmatpush1.bf16.msra.mxu1 %v604_v16  ;;  %v635_v38 = vld [vmem:[#allocation8 + $0xa4] ss:$8 sps:$4 sm:$0xff]   ;;  %v637_v39 = vld [vmem:[#allocation8 + $0xa0] ss:$8 sps:$4 sm:$0xff]   ;;  %v638_v40 = vld [vmem:[#allocation8 + $0x94] ss:$8 sps:$4 sm:$0xff]  }
  0x45   :  { %196 = vmatpush1.bf16.msra.mxu0 %v591_v11  ;;  %446 = vmatprep.subr.bf16.mxu1 %v605_v17  ;;  %v640_v41 = vld [vmem:[#allocation8 + $0x90] ss:$8 sps:$4 sm:$0xff]   ;;  %v641_v42 = vld [vmem:[#allocation8 + $0x84] ss:$8 sps:$4 sm:$0xff]   ;;  %v643_v43 = vld [vmem:[#allocation8 + $0x80] ss:$8 sps:$4 sm:$0xff]  }
  0x46   :  { %197 = vmatprep.subr.bf16.mxu0 %v592_v13  ;;  %v120_v46 = vsub.s32 1, %v115_v45  ;;  %v116_v47 = vsub.s32 0, %v115_v45  ;;  %v112_v48 = vld [vmem:[%s829_s3] sm:$0x3]  ;;  %v81_v50 = vld [vmem:[#allocation5 + $0x8] sm:$0xff]  ;;  %v80_v53 = vld [vmem:[#allocation5] sm:$0xff] }
  0x47   :  { %v83_v51 = vld [vmem:[#allocation5 + $0x18] sm:$0xff]  ;;  %v82_v54 = vld [vmem:[#allocation5 + $0x10] sm:$0xff]  ;;  %v85_v57 = vand.u32 65535, %v81_v50  ;;  %v84_v60 = vand.u32 65535, %v80_v53  ;;  %v92_v11 = vshrl.u32 %v80_v53, 16  ;;  %v93_v13 = vshrl.u32 %v81_v50, 16 }
  0x48   :  { %447 = vmatpush1.bf16.msra.mxu1 %v607_v19  ;;  %v121_v52 = vrot.slane %v112_v48, %v120_v46  ;;  %v117_v55 = vrot.slane %v112_v48, %v116_v47  ;;  %v87_v58 = vand.u32 65535, %v83_v51  ;;  %v86_v61 = vand.u32 65535, %v82_v54  ;;  %v268_v9 = vld [vmem:[%s831_s5] sm:$0x3]  ;;  %s763_s5 = smov [#allocation10]  }
  0x49   :  { %198 = vmatpush1.bf16.msra.mxu0 %v594_v15  ;;  %448 = vmatprep.subr.bf16.mxu1 %v608_v20  ;;  %vm89_vm1 = vcmp.lt.u32.totalorder %v85_v57, 32768  ;;  %vm88_vm3 = vcmp.lt.u32.totalorder %v84_v60, 32768  ;;  %v273_v10 = vrot.slane %v268_v9, %v116_v47  ;;  %v277_v12 = vrot.slane %v268_v9, %v120_v46  ;;  %s504_s22 = sshll.u32 %s763_s5, 4  ;;  %s505_s22 = int_to_ptr.vmem [resolvable:$true] %s504_s22 }
  0x4a   :  { %vm91_vm2 = vcmp.lt.u32.totalorder %v87_v58, 32768  ;;  %vm90_vm4 = vcmp.lt.u32.totalorder %v86_v61, 32768  ;;  %vm96_vm7 = vcmp.lt.u32.totalorder %v92_v11, 32768  ;;  %v94_v17 = vshrl.u32 %v82_v54, 16  ;;  %s724_s23 = scalar_lea.vmem %s505_s22, 512  ;;  %p729_p7 = scmp.lt.s32.totalorder %s505_s22, %s505_s22 }
  0x4b   :  { %vm562_vm5 = vmpackc.low %vm91_vm2, %vm89_vm1  ;;  %v95_v20 = vshrl.u32 %v83_v51, 16  ;;  %vm97_vm8 = vcmp.lt.u32.totalorder %v93_v13, 32768  ;;  %p725_p6 = scmp.ne.s32.totalorder %s505_s22, %s724_s23  ;;  %p730_p8 = scmp.lt.s32.totalorder %s724_s23, %s724_s23 }
  0x4c   :  { %529 = vmatmul.mubr.msk.bf16.vlgmr.msra.gmra.mxu0 %vm179_vm0, %v595_v18  ;;  %449 = vmatpush1.bf16.msra.mxu1 %v610_v21  ;;  %vm565_vm6 = vmpackc.low %vm90_vm4, %vm88_vm3  ;;  %vm98_vm9 = vcmp.lt.u32.totalorder %v94_v17, 32768 }
  0x4d   :  { %450 = vmatprep.subr.bf16.mxu1 %v611_v22  ;;  %vm99_vm10 = vcmp.lt.u32.totalorder %v95_v20, 32768  ;;  %p731_p9 = por %p730_p8, %p729_p7 }
  0x4f   :  { %p732_p10 = pnand %p731_p9, %p725_p6 }
  0x50   :  { %451 = vmatpush1.bf16.msra.mxu1 %v613_v23 }
  0x51   :  { %452 = vmatprep.subr.bf16.mxu1 %v614_v24 }
  0x54   :  { %453 = vmatpush1.bf16.msra.mxu1 %v616_v25 }
  0x55   :  { %454 = vmatprep.subr.bf16.mxu1 %v617_v26 }
  0x58   :  { %455 = vmatpush1.bf16.msra.mxu1 %v619_v27 }
  0x59   :  { %456 = vmatprep.subr.bf16.mxu1 %v620_v28 }
  0x5c   :  { %457 = vmatpush2.bf16.msra.mxu1 %v622_v29 }
  0x5d   :  { %458 = vmatprep.subr.bf16.mxu1 %v623_v30 }
  0x60   :  { %459 = vmatpush2.bf16.msra.mxu1 %v625_v31 }
  0x61   :  { %460 = vmatprep.subr.bf16.mxu1 %v626_v32 }
  0x64   :  { %461 = vmatpush2.bf16.msra.mxu1 %v628_v33 }
  0x65   :  { %462 = vmatprep.subr.bf16.mxu1 %v629_v34 }
  0x68   :  { %463 = vmatpush2.bf16.msra.mxu1 %v631_v35 }
  0x69   :  { %464 = vmatprep.subr.bf16.mxu1 %v632_v36 }
  0x6c   :  { %465 = vmatpush2.bf16.msra.mxu1 %v634_v37 }
  0x6d   :  { %466 = vmatprep.subr.bf16.mxu1 %v635_v38 }
  0x70   :  { %467 = vmatpush2.bf16.msra.mxu1 %v637_v39 }
  0x71   :  { %468 = vmatprep.subr.bf16.mxu1 %v638_v40 }
  0x74   :  { %469 = vmatpush2.bf16.msra.mxu1 %v640_v41 }
  0x75   :  { %470 = vmatprep.subr.bf16.mxu1 %v641_v42 }
  0x78   :  { %471 = vmatpush2.bf16.msra.mxu1 %v643_v43 }
 0x10c   :  { %v217_v49 = vpop.f32.mrf.mxu0 }
 0x10d   :  { %v218_v0 = vadd.f32 %v217_v49, %v117_v55 }
 0x10e   :  { %v219_v56 = vpop.f32.mrf.mxu0 }
 0x10f   :  { %v220_v62 = vadd.f32 %v219_v56, %v121_v52  ;;  %v226_v6 = vmax.f32 %v218_v0, 0.0 }
 0x110   :  { %v221_v59 = vpop.f32.mrf.mxu0 }
 0x111   :  { %v222_v63 = vadd.f32 %v221_v59, %v117_v55  ;;  %v227_v4 = vmax.f32 %v220_v62, 0.0 }
 0x112   :  { %v223_v1 = vpop.f32.mrf.mxu0 }
 0x113   :  { %v224_v2 = vadd.f32 %v223_v1, %v121_v52  ;;  %v228_v3 = vmax.f32 %v222_v63, 0.0 }
 0x115   :  { %v229_v5 = vmax.f32 %v224_v2, 0.0  ;;  %v566_v8 = vpack.c.bf16 %v228_v3, %v226_v6 }
 0x117   :  { %v563_v7 = vpack.c.bf16 %v229_v5, %v227_v4 }
 0x119   :  { %564 = vmatprep.mubr.msk.bf16.mxu1 %vm562_vm5, %v563_v7 }
 0x11a   :  { %567 = vmatmul.mubr.msk.bf16.vlgmr.msra.gmra.mxu1 %vm565_vm6, %v566_v8 }
 0x1da   :  { %v474_v14 = vpop.f32.mrf.mxu1 }
 0x1db   :  { %v475_v15 = vadd.f32 %v474_v14, %v273_v10 }
 0x1dc   :  { %v476_v16 = vpop.f32.mrf.mxu1 }
 0x1dd   :  { %v483_v18 = vmax.f32 %v475_v15, 0.0  ;;  %v477_v19 = vadd.f32 %v476_v16, %v277_v12 }
 0x1de   :  { %v478_v21 = vpop.f32.mrf.mxu1 }
 0x1df   :  { %v487_v22 = vsel %vm96_vm7, %v483_v18, 0.0  ;;  %v484_v23 = vmax.f32 %v477_v19, 0.0  ;;  %v479_v24 = vadd.f32 %v478_v21, %v273_v10 }
 0x1e0   :  { %v491_v25 = vmul.f32 2.0, %v487_v22  ;;  %v480_v26 = vpop.f32.mrf.mxu1 }
 0x1e1   :  { %v488_v27 = vsel %vm97_vm8, %v484_v23, 0.0  ;;  %v485_v28 = vmax.f32 %v479_v24, 0.0  ;;  %v481_v29 = vadd.f32 %v480_v26, %v277_v12 }
 0x1e2   :  { %495 = vst [vmem:[#allocation10] sm:$0xff] %v491_v25  ;;  %v492_v30 = vmul.f32 2.0, %v488_v27 }
 0x1e3   :  { %v489_v31 = vsel %vm98_vm9, %v485_v28, 0.0  ;;  %v486_v32 = vmax.f32 %v481_v29, 0.0 }
 0x1e4   :  { %496 = vst [vmem:[#allocation10 + $0x8] sm:$0xff] %v492_v30  ;;  %v493_v33 = vmul.f32 2.0, %v489_v31 }
 0x1e5   :  { %v490_v34 = vsel %vm99_vm10, %v486_v32, 0.0 }
 0x1e6   :  { %497 = vst [vmem:[#allocation10 + $0x10] sm:$0xff] %v493_v33  ;;  %v494_v35 = vmul.f32 2.0, %v490_v34 }
 0x1e8   :  { %498 = vst [vmem:[#allocation10 + $0x18] sm:$0xff] %v494_v35 }
 0x1e9   :  { %735 = shalt.err (!%p732_p10)
}
 0x1ea   :  { %510 = dma.vmem_to_hbm [thread:$0]  %s505_s22, 512, %s832_s6, [#allocation4], %s753_s24, %s753_s24, %s754_s25  }
 0x1eb   :  { %750 = dma.done.wait [#allocation4], 512  }
 0x1ec   :  { %751 = vsyncadd [#allocation4], 4294966784 }
 0x1ed   :  { %514 = vsyncpa [#allocation3], 1 }
 0x1ee   :  { %515 = vsyncpa [#allocation6], 1 }
 0x1ef   :  { %516 = vsyncpa [#allocation9], 1 }
 0x1f0   :  { %517 = vsyncpa [#allocation4], 1 }

</bundles_post_ra>
